<compile_context>
chip_gen: v7x
topology: tpu7x:2x2x1
jax: 0.10.0
libtpu: 0.0.40
codegen_flags: <defaults>
</compile_context>

<pallas_src>
import functools

import jax
import jax.numpy as jnp
from jax import lax
from jax.experimental import pallas as pl
from jax.experimental.pallas import tpu as pltpu


ASPP_RATES = (6, 12, 18, 24)
KSIZE = 3


# ----------------------------------------------------------------------------
# Pallas kernel: the full ASPP forward for one batch element (channels-major).
# ----------------------------------------------------------------------------
def _aspp_kernel(xcol_ref, w3_ref, b3_ref, w1_ref, b1_ref, wo_ref, bo_ref,
                 o_ref, *, num_rates):
    """Fused ASPP classifier.

    xcol_ref: (1, R, K*K*Cin, H*W)  im2col'd input, one slab per dilation rate
    w3_ref  : (R, Cmid, K*K*Cin)    dilated-3x3 weights (one big-K matmul/branch)
    b3_ref  : (R, Cmid, 1)
    w1_ref  : (Cmid, Cmid)          shared conv_1x1
    b1_ref  : (Cmid, 1)
    wo_ref  : (Cls, Cmid)           shared conv_1x1_out
    bo_ref  : (Cls, 1)
    o_ref   : (1, Cls, H*W)         lane-dense output (H*W on the lanes)
    """
    w1 = w1_ref[...]
    b1 = b1_ref[...]

    z_sum = None
    for ri in range(num_rates):                       # unrolled, R = 4
        patch = xcol_ref[0, ri]                       # (K*K*Cin, HW)
        # Branch dilated 3x3 conv as ONE K=K*K*Cin matmul; bias+ReLU is a single
        # dense VPU sweep over (Cmid, 256). Dropout2d == identity at inference.
        y = jnp.dot(w3_ref[ri], patch, preferred_element_type=jnp.float32)
        y = jnp.maximum(y + b3_ref[ri], 0.0)          # (Cmid, HW)
        # Shared conv_1x1 + ReLU (applied per branch, before summing).
        z = jnp.dot(w1, y, preferred_element_type=jnp.float32)
        z = jnp.maximum(z + b1, 0.0)                  # (Cmid, HW)
        z_sum = z if z_sum is None else z_sum + z
    # conv_1x1_out is shared and linear:
    #   sum_r (Wo @ z_r + bo) == Wo @ (sum_r z_r) + R * bo   (exact algebraic identity)
    o = jnp.dot(wo_ref[...], z_sum, preferred_element_type=jnp.float32)
    o_ref[0] = o + jnp.float32(num_rates) * bo_ref[...]


# ----------------------------------------------------------------------------
# Host-side prep (cheap XLA on the tiny input): pad once + im2col, channels-major.
# ----------------------------------------------------------------------------
def _im2col_nchw(x, rates, ksize=KSIZE):
    """x: (N, Cin, H, W) -> (N, R, ksize*ksize*Cin, H*W).

    'same' conv with padding == dilation per branch; column ordering is
    (kh, kw, cin) fastest-cin, matching the weight reshape below.
    """
    N, Cin, H, W = x.shape
    pad = max(rates) * (ksize // 2)
    xp = jnp.pad(x, ((0, 0), (0, 0), (pad, pad), (pad, pad)))
    slabs = []
    for r in rates:
        off = pad - r * (ksize // 2)
        taps = []
        for kh in range(ksize):
            for kw in range(ksize):
                h0 = off + kh * r
                w0 = off + kw * r
                taps.append(xp[:, :, h0:h0 + H, w0:w0 + W])      # (N, Cin, H, W)
        slab = jnp.stack(taps, axis=1)                           # (N, K*K, Cin, H, W)
        slabs.append(slab.reshape(N, ksize * ksize * Cin, H * W))
    return jnp.stack(slabs, axis=1)                              # (N, R, K*K*Cin, H*W)


# ----------------------------------------------------------------------------
# ASPP forward (single fused Pallas kernel)
# ----------------------------------------------------------------------------
@jax.jit
def aspp_forward(x, params):
    rates = ASPP_RATES
    N, Cin, H, W = x.shape
    R = len(rates)
    KK = KSIZE * KSIZE
    HW = H * W
    Cmid = params["w3"].shape[1]          # out_channels of the dilated convs
    Cls = params["wo"].shape[0]           # num_classes

    # --- layout prep on the host (one tiny fused XLA stage) --------------------
    xcol = _im2col_nchw(x, rates)                                     # (N, R, KK*Cin, HW)
    # PyTorch OIHW (R, O, I, 3, 3) -> (R, O, kh, kw, I) -> (R, O, KK*Cin)
    w3t = jnp.transpose(params["w3"], (0, 1, 3, 4, 2)).reshape(R, Cmid, KK * Cin)
    b3 = params["b3"].reshape(R, Cmid, 1)
    w1t = params["w1"].reshape(Cmid, Cmid)                            # (O, I, 1, 1) -> (O, I)
    b1 = params["b1"].reshape(Cmid, 1)
    wot = params["wo"].reshape(Cls, Cmid)
    bo = params["bo"].reshape(Cls, 1)

    out = pl.pallas_call(
        functools.partial(_aspp_kernel, num_rates=R),
        out_shape=jax.ShapeDtypeStruct((N, Cls, HW), jnp.float32),
        grid=(N,),
        in_specs=[
            pl.BlockSpec((1, R, KK * Cin, HW), lambda n: (n, 0, 0, 0)),
            pl.BlockSpec((R, Cmid, KK * Cin), lambda n: (0, 0, 0)),
            pl.BlockSpec((R, Cmid, 1), lambda n: (0, 0, 0)),
            pl.BlockSpec((Cmid, Cmid), lambda n: (0, 0)),
            pl.BlockSpec((Cmid, 1), lambda n: (0, 0)),
            pl.BlockSpec((Cls, Cmid), lambda n: (0, 0)),
            pl.BlockSpec((Cls, 1), lambda n: (0, 0)),
        ],
        out_specs=pl.BlockSpec((1, Cls, HW), lambda n: (n, 0, 0)),
        compiler_params=pltpu.CompilerParams(dimension_semantics=("parallel",)),
    )(xcol, w3t, b3, w1t, b1, wot, bo)

    # (N, Cls, H*W) -> (N, Cls, H, W): same memory layout, free bitcast reshape.
    return out.reshape(N, Cls, H, W)


# ----------------------------------------------------------------------------
# Params (PyTorch layouts) + pure-JAX reference for an in-script sanity check.
# ----------------------------------------------------------------------------
def init_params(key, in_channels=4, out_channels=16, num_classes=21):
    R = len(ASPP_RATES)
    k = jax.random.split(key, 6)
    s = 0.1
    return {
        # conv_3x3_r{6,12,18,24}: stacked PyTorch OIHW weights
        "w3": s * jax.random.normal(k[0], (R, out_channels, in_channels, 3, 3), jnp.float32),
        "b3": s * jax.random.normal(k[1], (R, out_channels), jnp.float32),
        # conv_1x1 (shared across branches)
        "w1": s * jax.random.normal(k[2], (out_channels, out_channels, 1, 1), jnp.float32),
        "b1": s * jax.random.normal(k[3], (out_channels,), jnp.float32),
        # conv_1x1_out (shared across branches)
        "wo": s * jax.random.normal(k[4], (num_classes, out_channels, 1, 1), jnp.float32),
        "bo": s * jax.random.normal(k[5], (num_classes,), jnp.float32),
    }


def _aspp_reference(x, params):
    """Straight transcription of the PyTorch forward with lax convs (eval mode)."""
    dn = ("NCHW", "OIHW", "NCHW")
    hi = lax.Precision.HIGHEST
    out = None
    for ri, r in enumerate(ASPP_RATES):
        y = lax.conv_general_dilated(x, params["w3"][ri], (1, 1), [(r, r), (r, r)],
                                     rhs_dilation=(r, r), dimension_numbers=dn,
                                     precision=hi)
        y = jnp.maximum(y + params["b3"][ri][None, :, None, None], 0.0)
        z = lax.conv_general_dilated(y, params["w1"], (1, 1), "VALID",
                                     dimension_numbers=dn, precision=hi)
        z = jnp.maximum(z + params["b1"][None, :, None, None], 0.0)
        o = lax.conv_general_dilated(z, params["wo"], (1, 1), "VALID",
                                     dimension_numbers=dn, precision=hi)
        o = o + params["bo"][None, :, None, None]
        out = o if out is None else out + o
    return out


if __name__ == "__main__":
    key = jax.random.PRNGKey(0)
    kx, kp = jax.random.split(key)

    # Small shapes consistent with the module: NCHW input, 16x16 feature map.
    x = jax.random.normal(kx, (2, 4, 16, 16), jnp.float32)
    params = init_params(kp, in_channels=4, out_channels=16, num_classes=21)

    out = aspp_forward(x, params)
    out = jax.block_until_ready(out)

    assert out.shape == (2, 21, 16, 16), out.shape
    assert out.dtype == jnp.float32
    assert bool(jnp.all(jnp.isfinite(out)))

    ref = _aspp_reference(x, params)
    max_err = float(jnp.max(jnp.abs(out - ref)))
    assert max_err < 1e-2, f"mismatch vs reference: {max_err}"

    print("KERNEL_OK")
</pallas_src>

<mosaic_0001>
module attributes {stable_mosaic.version = 11 : i64} {
  func.func @_aspp_kernel(%arg0: i32, %arg1: memref<1x4x36x256xf32, #tpu.memory_space<vmem>>, %arg2: memref<4x16x36xf32, #tpu.memory_space<vmem>>, %arg3: memref<4x16x1xf32, #tpu.memory_space<vmem>>, %arg4: memref<16x16xf32, #tpu.memory_space<vmem>>, %arg5: memref<16x1xf32, #tpu.memory_space<vmem>>, %arg6: memref<21x16xf32, #tpu.memory_space<vmem>>, %arg7: memref<21x1xf32, #tpu.memory_space<vmem>>, %arg8: memref<1x21x256xf32, #tpu.memory_space<vmem>>) attributes {dimension_semantics = [#tpu.dimension_semantics<parallel>], iteration_bounds = array<i64: 2>, scalar_prefetch = 0 : i64, scratch_operands = 0 : i64, tpu.core_type = #tpu.core_type<tc>, window_params = [{transform_indices = @transform_0, window_bounds = array<i64: 1, 4, 36, 256>}, {pipeline_mode = #tpu.pipeline_mode<synchronous>, transform_indices = @transform_1, window_bounds = array<i64: 4, 16, 36>}, {pipeline_mode = #tpu.pipeline_mode<synchronous>, transform_indices = @transform_2, window_bounds = array<i64: 4, 16, 1>}, {pipeline_mode = #tpu.pipeline_mode<synchronous>, transform_indices = @transform_3, window_bounds = array<i64: 16, 16>}, {pipeline_mode = #tpu.pipeline_mode<synchronous>, transform_indices = @transform_4, window_bounds = array<i64: 16, 1>}, {pipeline_mode = #tpu.pipeline_mode<synchronous>, transform_indices = @transform_5, window_bounds = array<i64: 21, 16>}, {pipeline_mode = #tpu.pipeline_mode<synchronous>, transform_indices = @transform_6, window_bounds = array<i64: 21, 1>}, {transform_indices = @transform_7, window_bounds = array<i64: 1, 21, 256>}]} {
    %c0 = arith.constant 0 : index
    %c0_0 = arith.constant 0 : index
    %0 = vector.load %arg4[%c0, %c0_0] : memref<16x16xf32, #tpu.memory_space<vmem>>, vector<16x16xf32>
    %c0_1 = arith.constant 0 : index
    %c0_2 = arith.constant 0 : index
    %1 = vector.load %arg5[%c0_1, %c0_2] : memref<16x1xf32, #tpu.memory_space<vmem>>, vector<16x1xf32>
    %c0_3 = arith.constant 0 : index
    %c0_4 = arith.constant 0 : index
    %c0_5 = arith.constant 0 : index
    %c0_6 = arith.constant 0 : index
    %2 = vector.load %arg1[%c0_3, %c0_4, %c0_5, %c0_6] : memref<1x4x36x256xf32, #tpu.memory_space<vmem>>, vector<1x1x36x256xf32>
    %3 = vector.shape_cast %2 : vector<1x1x36x256xf32> to vector<36x256xf32>
    %c0_7 = arith.constant 0 : index
    %c0_8 = arith.constant 0 : index
    %c0_9 = arith.constant 0 : index
    %4 = vector.load %arg2[%c0_7, %c0_8, %c0_9] : memref<4x16x36xf32, #tpu.memory_space<vmem>>, vector<1x16x36xf32>
    %5 = vector.shape_cast %4 : vector<1x16x36xf32> to vector<16x36xf32>
    %cst = arith.constant dense<0.000000e+00> : vector<16x256xf32>
    %6 = tpu.matmul %5, %3, %cst {dimension_numbers = #tpu.dot_dimension_numbers<[1], [0], [0], [1], [0, 0, 1, 1], [], []>} : vector<16x36xf32>, vector<36x256xf32>, vector<16x256xf32> -> vector<16x256xf32>
    %c0_10 = arith.constant 0 : index
    %c0_11 = arith.constant 0 : index
    %c0_12 = arith.constant 0 : index
    %7 = vector.load %arg3[%c0_10, %c0_11, %c0_12] : memref<4x16x1xf32, #tpu.memory_space<vmem>>, vector<1x16x1xf32>
    %8 = vector.shape_cast %7 : vector<1x16x1xf32> to vector<16x1xf32>
    %9 = vector.broadcast %8 : vector<16x1xf32> to vector<16x256xf32>
    %10 = arith.addf %6, %9 : vector<16x256xf32>
    %cst_13 = arith.constant 0.000000e+00 : f32
    %11 = vector.broadcast %cst_13 : f32 to vector<16x256xf32>
    %12 = arith.maximumf %10, %11 : vector<16x256xf32>
    %cst_14 = arith.constant dense<0.000000e+00> : vector<16x256xf32>
    %13 = tpu.matmul %0, %12, %cst_14 {dimension_numbers = #tpu.dot_dimension_numbers<[1], [0], [0], [1], [0, 0, 1, 1], [], []>} : vector<16x16xf32>, vector<16x256xf32>, vector<16x256xf32> -> vector<16x256xf32>
    %14 = vector.broadcast %1 : vector<16x1xf32> to vector<16x256xf32>
    %15 = arith.addf %13, %14 : vector<16x256xf32>
    %cst_15 = arith.constant 0.000000e+00 : f32
    %16 = vector.broadcast %cst_15 : f32 to vector<16x256xf32>
    %17 = arith.maximumf %15, %16 : vector<16x256xf32>
    %c0_16 = arith.constant 0 : index
    %c1 = arith.constant 1 : index
    %c0_17 = arith.constant 0 : index
    %c0_18 = arith.constant 0 : index
    %18 = vector.load %arg1[%c0_16, %c1, %c0_17, %c0_18] : memref<1x4x36x256xf32, #tpu.memory_space<vmem>>, vector<1x1x36x256xf32>
    %19 = vector.shape_cast %18 : vector<1x1x36x256xf32> to vector<36x256xf32>
    %c1_19 = arith.constant 1 : index
    %c0_20 = arith.constant 0 : index
    %c0_21 = arith.constant 0 : index
    %20 = vector.load %arg2[%c1_19, %c0_20, %c0_21] : memref<4x16x36xf32, #tpu.memory_space<vmem>>, vector<1x16x36xf32>
    %21 = vector.shape_cast %20 : vector<1x16x36xf32> to vector<16x36xf32>
    %cst_22 = arith.constant dense<0.000000e+00> : vector<16x256xf32>
    %22 = tpu.matmul %21, %19, %cst_22 {dimension_numbers = #tpu.dot_dimension_numbers<[1], [0], [0], [1], [0, 0, 1, 1], [], []>} : vector<16x36xf32>, vector<36x256xf32>, vector<16x256xf32> -> vector<16x256xf32>
    %c1_23 = arith.constant 1 : index
    %c0_24 = arith.constant 0 : index
    %c0_25 = arith.constant 0 : index
    %23 = vector.load %arg3[%c1_23, %c0_24, %c0_25] : memref<4x16x1xf32, #tpu.memory_space<vmem>>, vector<1x16x1xf32>
    %24 = vector.shape_cast %23 : vector<1x16x1xf32> to vector<16x1xf32>
    %25 = vector.broadcast %24 : vector<16x1xf32> to vector<16x256xf32>
    %26 = arith.addf %22, %25 : vector<16x256xf32>
    %cst_26 = arith.constant 0.000000e+00 : f32
    %27 = vector.broadcast %cst_26 : f32 to vector<16x256xf32>
    %28 = arith.maximumf %26, %27 : vector<16x256xf32>
    %cst_27 = arith.constant dense<0.000000e+00> : vector<16x256xf32>
    %29 = tpu.matmul %0, %28, %cst_27 {dimension_numbers = #tpu.dot_dimension_numbers<[1], [0], [0], [1], [0, 0, 1, 1], [], []>} : vector<16x16xf32>, vector<16x256xf32>, vector<16x256xf32> -> vector<16x256xf32>
    %30 = vector.broadcast %1 : vector<16x1xf32> to vector<16x256xf32>
    %31 = arith.addf %29, %30 : vector<16x256xf32>
    %cst_28 = arith.constant 0.000000e+00 : f32
    %32 = vector.broadcast %cst_28 : f32 to vector<16x256xf32>
    %33 = arith.maximumf %31, %32 : vector<16x256xf32>
    %34 = arith.addf %17, %33 : vector<16x256xf32>
    %c0_29 = arith.constant 0 : index
    %c2 = arith.constant 2 : index
    %c0_30 = arith.constant 0 : index
    %c0_31 = arith.constant 0 : index
    %35 = vector.load %arg1[%c0_29, %c2, %c0_30, %c0_31] : memref<1x4x36x256xf32, #tpu.memory_space<vmem>>, vector<1x1x36x256xf32>
    %36 = vector.shape_cast %35 : vector<1x1x36x256xf32> to vector<36x256xf32>
    %c2_32 = arith.constant 2 : index
    %c0_33 = arith.constant 0 : index
    %c0_34 = arith.constant 0 : index
    %37 = vector.load %arg2[%c2_32, %c0_33, %c0_34] : memref<4x16x36xf32, #tpu.memory_space<vmem>>, vector<1x16x36xf32>
    %38 = vector.shape_cast %37 : vector<1x16x36xf32> to vector<16x36xf32>
    %cst_35 = arith.constant dense<0.000000e+00> : vector<16x256xf32>
    %39 = tpu.matmul %38, %36, %cst_35 {dimension_numbers = #tpu.dot_dimension_numbers<[1], [0], [0], [1], [0, 0, 1, 1], [], []>} : vector<16x36xf32>, vector<36x256xf32>, vector<16x256xf32> -> vector<16x256xf32>
    %c2_36 = arith.constant 2 : index
    %c0_37 = arith.constant 0 : index
    %c0_38 = arith.constant 0 : index
    %40 = vector.load %arg3[%c2_36, %c0_37, %c0_38] : memref<4x16x1xf32, #tpu.memory_space<vmem>>, vector<1x16x1xf32>
    %41 = vector.shape_cast %40 : vector<1x16x1xf32> to vector<16x1xf32>
    %42 = vector.broadcast %41 : vector<16x1xf32> to vector<16x256xf32>
    %43 = arith.addf %39, %42 : vector<16x256xf32>
    %cst_39 = arith.constant 0.000000e+00 : f32
    %44 = vector.broadcast %cst_39 : f32 to vector<16x256xf32>
    %45 = arith.maximumf %43, %44 : vector<16x256xf32>
    %cst_40 = arith.constant dense<0.000000e+00> : vector<16x256xf32>
    %46 = tpu.matmul %0, %45, %cst_40 {dimension_numbers = #tpu.dot_dimension_numbers<[1], [0], [0], [1], [0, 0, 1, 1], [], []>} : vector<16x16xf32>, vector<16x256xf32>, vector<16x256xf32> -> vector<16x256xf32>
    %47 = vector.broadcast %1 : vector<16x1xf32> to vector<16x256xf32>
    %48 = arith.addf %46, %47 : vector<16x256xf32>
    %cst_41 = arith.constant 0.000000e+00 : f32
    %49 = vector.broadcast %cst_41 : f32 to vector<16x256xf32>
    %50 = arith.maximumf %48, %49 : vector<16x256xf32>
    %51 = arith.addf %34, %50 : vector<16x256xf32>
    %c0_42 = arith.constant 0 : index
    %c3 = arith.constant 3 : index
    %c0_43 = arith.constant 0 : index
    %c0_44 = arith.constant 0 : index
    %52 = vector.load %arg1[%c0_42, %c3, %c0_43, %c0_44] : memref<1x4x36x256xf32, #tpu.memory_space<vmem>>, vector<1x1x36x256xf32>
    %53 = vector.shape_cast %52 : vector<1x1x36x256xf32> to vector<36x256xf32>
    %c3_45 = arith.constant 3 : index
    %c0_46 = arith.constant 0 : index
    %c0_47 = arith.constant 0 : index
    %54 = vector.load %arg2[%c3_45, %c0_46, %c0_47] : memref<4x16x36xf32, #tpu.memory_space<vmem>>, vector<1x16x36xf32>
    %55 = vector.shape_cast %54 : vector<1x16x36xf32> to vector<16x36xf32>
    %cst_48 = arith.constant dense<0.000000e+00> : vector<16x256xf32>
    %56 = tpu.matmul %55, %53, %cst_48 {dimension_numbers = #tpu.dot_dimension_numbers<[1], [0], [0], [1], [0, 0, 1, 1], [], []>} : vector<16x36xf32>, vector<36x256xf32>, vector<16x256xf32> -> vector<16x256xf32>
    %c3_49 = arith.constant 3 : index
    %c0_50 = arith.constant 0 : index
    %c0_51 = arith.constant 0 : index
    %57 = vector.load %arg3[%c3_49, %c0_50, %c0_51] : memref<4x16x1xf32, #tpu.memory_space<vmem>>, vector<1x16x1xf32>
    %58 = vector.shape_cast %57 : vector<1x16x1xf32> to vector<16x1xf32>
    %59 = vector.broadcast %58 : vector<16x1xf32> to vector<16x256xf32>
    %60 = arith.addf %56, %59 : vector<16x256xf32>
    %cst_52 = arith.constant 0.000000e+00 : f32
    %61 = vector.broadcast %cst_52 : f32 to vector<16x256xf32>
    %62 = arith.maximumf %60, %61 : vector<16x256xf32>
    %cst_53 = arith.constant dense<0.000000e+00> : vector<16x256xf32>
    %63 = tpu.matmul %0, %62, %cst_53 {dimension_numbers = #tpu.dot_dimension_numbers<[1], [0], [0], [1], [0, 0, 1, 1], [], []>} : vector<16x16xf32>, vector<16x256xf32>, vector<16x256xf32> -> vector<16x256xf32>
    %64 = vector.broadcast %1 : vector<16x1xf32> to vector<16x256xf32>
    %65 = arith.addf %63, %64 : vector<16x256xf32>
    %cst_54 = arith.constant 0.000000e+00 : f32
    %66 = vector.broadcast %cst_54 : f32 to vector<16x256xf32>
    %67 = arith.maximumf %65, %66 : vector<16x256xf32>
    %68 = arith.addf %51, %67 : vector<16x256xf32>
    %c0_55 = arith.constant 0 : index
    %c0_56 = arith.constant 0 : index
    %69 = vector.load %arg6[%c0_55, %c0_56] : memref<21x16xf32, #tpu.memory_space<vmem>>, vector<21x16xf32>
    %cst_57 = arith.constant dense<0.000000e+00> : vector<21x256xf32>
    %70 = tpu.matmul %69, %68, %cst_57 {dimension_numbers = #tpu.dot_dimension_numbers<[1], [0], [0], [1], [0, 0, 1, 1], [], []>} : vector<21x16xf32>, vector<16x256xf32>, vector<21x256xf32> -> vector<21x256xf32>
    %c0_58 = arith.constant 0 : index
    %c0_59 = arith.constant 0 : index
    %71 = vector.load %arg7[%c0_58, %c0_59] : memref<21x1xf32, #tpu.memory_space<vmem>>, vector<21x1xf32>
    %cst_60 = arith.constant 4.000000e+00 : f32
    %72 = vector.broadcast %cst_60 : f32 to vector<21x1xf32>
    %73 = arith.mulf %72, %71 : vector<21x1xf32>
    %74 = vector.broadcast %73 : vector<21x1xf32> to vector<21x256xf32>
    %75 = arith.addf %70, %74 : vector<21x256xf32>
    %c0_61 = arith.constant 0 : index
    %c0_62 = arith.constant 0 : index
    %c0_63 = arith.constant 0 : index
    %76 = vector.load %arg8[%c0_61, %c0_62, %c0_63] : memref<1x21x256xf32, #tpu.memory_space<vmem>>, vector<1x21x256xf32>
    %77 = vector.shape_cast %76 : vector<1x21x256xf32> to vector<21x256xf32>
    %78 = vector.shape_cast %75 : vector<21x256xf32> to vector<1x21x256xf32>
    tpu.vector_store %arg8[%c0_61, %c0_62, %c0_63], %78 {strides = array<i32>} : memref<1x21x256xf32, #tpu.memory_space<vmem>>, vector<1x21x256xf32>,
    return
  }
  func.func @transform_0(%arg0: i32) -> (i32, i32, i32, i32) {
    %c0_i32 = arith.constant 0 : i32
    %c0_i32_0 = arith.constant 0 : i32
    %c0_i32_1 = arith.constant 0 : i32
    %c0_i32_2 = arith.constant 0 : i32
    return %arg0, %c0_i32, %c0_i32_0, %c0_i32_1 : i32, i32, i32, i32
  }
  func.func @transform_1(%arg0: i32) -> (i32, i32, i32) {
    %c0_i32 = arith.constant 0 : i32
    %c0_i32_0 = arith.constant 0 : i32
    %c0_i32_1 = arith.constant 0 : i32
    %c0_i32_2 = arith.constant 0 : i32
    return %c0_i32, %c0_i32_0, %c0_i32_1 : i32, i32, i32
  }
  func.func @transform_2(%arg0: i32) -> (i32, i32, i32) {
    %c0_i32 = arith.constant 0 : i32
    %c0_i32_0 = arith.constant 0 : i32
    %c0_i32_1 = arith.constant 0 : i32
    %c0_i32_2 = arith.constant 0 : i32
    return %c0_i32, %c0_i32_0, %c0_i32_1 : i32, i32, i32
  }
  func.func @transform_3(%arg0: i32) -> (i32, i32) {
    %c0_i32 = arith.constant 0 : i32
    %c0_i32_0 = arith.constant 0 : i32
    %c0_i32_1 = arith.constant 0 : i32
    return %c0_i32, %c0_i32_0 : i32, i32
  }
  func.func @transform_4(%arg0: i32) -> (i32, i32) {
    %c0_i32 = arith.constant 0 : i32
    %c0_i32_0 = arith.constant 0 : i32
    %c0_i32_1 = arith.constant 0 : i32
    return %c0_i32, %c0_i32_0 : i32, i32
  }
  func.func @transform_5(%arg0: i32) -> (i32, i32) {
    %c0_i32 = arith.constant 0 : i32
    %c0_i32_0 = arith.constant 0 : i32
    %c0_i32_1 = arith.constant 0 : i32
    return %c0_i32, %c0_i32_0 : i32, i32
  }
  func.func @transform_6(%arg0: i32) -> (i32, i32) {
    %c0_i32 = arith.constant 0 : i32
    %c0_i32_0 = arith.constant 0 : i32
    %c0_i32_1 = arith.constant 0 : i32
    return %c0_i32, %c0_i32_0 : i32, i32
  }
  func.func @transform_7(%arg0: i32) -> (i32, i32, i32) {
    %c0_i32 = arith.constant 0 : i32
    %c0_i32_0 = arith.constant 0 : i32
    %c0_i32_1 = arith.constant 0 : i32
    return %arg0, %c0_i32, %c0_i32_0 : i32, i32, i32
  }
}

</mosaic_0001>

<bundles_post_ra>
// kernel: aspp_forward.1
= control target key start
LH: loop header
LB: loop body
LE: loop exit
PB: predicated region body
PF: predicated region fallthrough
CT: control target
= control target key end

     0   :  { %s1486_s24 = smov 0   ;;  %s1717_s0 = inlined_call_operand.vmem [shape: f32[2,4,36,256], index: 0, kind: input, shape index: {}]   ;;  %s1718_s1 = inlined_call_operand.vmem [shape: f32[4,16,36], index: 1, kind: input, shape index: {}]   ;;  %s1719_s2 = inlined_call_operand.vmem [shape: f32[4,16,1], index: 2, kind: input, shape index: {}]   ;;  %s1720_s3 = inlined_call_operand.vmem [shape: f32[16,16], index: 3, kind: input, shape index: {}]   ;;  %s1721_s4 = inlined_call_operand.vmem [shape: f32[16,1], index: 4, kind: input, shape index: {}]   ;;  %s1722_s5 = inlined_call_operand.vmem [shape: f32[21,16], index: 5, kind: input, shape index: {}]   ;;  %s1723_s6 = inlined_call_operand.vmem [shape: f32[21,1], index: 6, kind: input, shape index: {}]   ;;  %s1724_s7 = inlined_call_operand.vmem [shape: f32[2,21,256], index: 7, kind: output, shape index: {}]  }
   0x1 LB: > { %s1292_s25 = sadd.s32 4294967295, %s1442_s24   ;;  %p1296_p0 = scmp.ge.s32.totalorder %s1442_s24, 1  ;;  %s1442_s24 = sphi %s1486_s24, %s17_s24  }
   0x2   : > { %p237_p1 = scmp.lt.s32.totalorder %s1442_s24, 3 }
   0x4   : > { %p238_p2 = pnand %p1296_p0, %p237_p1 }
   0x5   : > { %p269_p3 = scmp.lt.s32.totalorder (!%p238_p2), %s1292_s25, 1  ;;  %v1444_v0 = vmov (!%p238_p2), 0.0   ;;  %v295_v1 = vld [vmem:[%s1719_s2] sm:$0xff] (!%p238_p2)  ;;  %v1445_v2 = vmov (!%p238_p2), 0   ;;  %v296_v3 = vld [vmem:[%s1719_s2 + $0x8] sm:$0xff] (!%p238_p2)  ;;  %v1357_v17 = vld [vmem:[%s1719_s2 + $0x30] sm:$0xff] (!%p238_p2) }
   0x6   : > { %241 = sbr.rel (%p238_p2) target bundleno = 1194 (0x4aa), region = 48  ;;  %385 = vmatprep.mubr.f32.mxu0 (!%p238_p2), %v1444_v0  ;;  %483 = vmatprep.mubr.f32.mxu1 (!%p238_p2), %v1444_v0  ;;  %v1337_v4 = vld [vmem:[%s1719_s2 + $0x20] sm:$0xff] (!%p238_p2)  ;;  %vm314_vm0 = vcmask (!%p238_p2), 1043456   ;;  %vm307_vm1 = vcmask (!%p238_p2), 293888   ;;  %v1120_v24 = vld [vmem:[%s1723_s6 + $0x10] sm:$0x1f] (!%p238_p2) }
   0x7   : > { %1434 = vset.pattern.permute.xlu0 (!%p238_p2), %v1445_v2  ;;  %1435 = vset.pattern.permute.xlu1 (!%p238_p2), %v1445_v2  ;;  %v281_v20 = vld [vmem:[%s1721_s4] sm:$0xff] (!%p238_p2)  ;;  %v294_v25 = vld [vmem:[%s1718_s1 + $0x8] sm:$0xff] (!%p238_p2)  ;;  %v1123_v26 = vmul.f32 (!%p238_p2), 4.0, %v1120_v24  ;;  %v1317_v27 = vld [vmem:[%s1719_s2 + $0x10] sm:$0xff] (!%p238_p2)  ;;  %vm412_vm2 = vcmask (!%p238_p2), 130048  }
   0x8   : > { %299 = vperm.xlu0 (!%p238_p2), %1434, %v295_v1   ;;  %v1118_v21 = vld [vmem:[%s1723_s6] sm:$0xff] (!%p238_p2)  ;;  %519 = vperm.xlu1 (!%p238_p2), %1435, %v1317_v27   ;;  %v1318_v28 = vld [vmem:[%s1719_s2 + $0x18] sm:$0xff] (!%p238_p2)  ;;  %v1338_v29 = vld [vmem:[%s1719_s2 + $0x28] sm:$0xff] (!%p238_p2) }
   0x9   : > { %v293_v22 = vld [vmem:[%s1718_s1] sm:$0xff] (!%p238_p2)  ;;  %v1121_v23 = vmul.f32 (!%p238_p2), 4.0, %v1118_v21  ;;  %v1358_v30 = vld [vmem:[%s1719_s2 + $0x38] sm:$0xff] (!%p238_p2)  ;;  %v282_v31 = vld [vmem:[%s1721_s4 + $0x8] sm:$0xff] (!%p238_p2) }
   0xa   : > { %v1119_v32 = vld [vmem:[%s1723_s6 + $0x8] sm:$0xff] (!%p238_p2)  ;;  %v1574_v57 = vld [vmem:[%s1720_s3] sm:$0xff] (!%p238_p2) }
   0xb   : > { %v1122_v33 = vmul.f32 (!%p238_p2), 4.0, %v1119_v32  ;;  %v1584_v62 = vld [vmem:[%s1720_s3 + $0x8] sm:$0xff] (!%p238_p2) }
   0xc   : > { %304 = vperm.xlu0 (!%p238_p2), %1434, %v296_v3   ;;  %524 = vperm.xlu1 (!%p238_p2), %1435, %v1318_v28   ;;  %v1315_v3 = vld [vmem:[%s1718_s1 + $0x10] sm:$0xff] (!%p238_p2) }
   0xd   : > { %s1726_s25 = smov (!%p269_p3, %s1292_s25), 1 }
   0xe   : > { %s1422_s28 = smul.u32 320, %s1726_s25 }
   0xf   : > { %s1423_s18 = smul.u32 48, %s1726_s25 }
  0x10   : > { %s1508_s10 = scalar_lea.vmem %s1717_s0, %s1422_s28  ;;  %724 = vperm.xlu0 %1434, %v1337_v4   ;;  %729 = vperm.xlu1 %1435, %v1338_v29   ;;  %v1316_v4 = vld [vmem:[%s1718_s1 + $0x18] sm:$0xff] }
  0x11   : > { %v284_v5 = vld [vmem:[%s1508_s10 + $0x8] sm:$0xff]  ;;  %v286_v6 = vld [vmem:[%s1508_s10 + $0x18] sm:$0xff]  ;;  %v283_v7 = vld [vmem:[%s1508_s10] sm:$0xff]  ;;  %s278_s21 = scalar_lea.vmem %s1724_s7, %s1423_s18 }
  0x12   : > { %v1370_v8 = vpack.c.bf16 %v286_v6, %v284_v5  ;;  %v285_v9 = vld [vmem:[%s1508_s10 + $0x10] sm:$0xff]  ;;  %v288_v10 = vld [vmem:[%s1508_s10 + $0x28] sm:$0xff]  ;;  %v290_v11 = vld [vmem:[%s1508_s10 + $0x38] sm:$0xff] }
  0x13   : > { %v1372_v12 = vpack.c.bf16 %v285_v9, %v283_v7  ;;  %v1374_v13 = vpack.c.bf16 %v290_v11, %v288_v10  ;;  %v287_v14 = vld [vmem:[%s1508_s10 + $0x20] sm:$0xff]  ;;  %v289_v15 = vld [vmem:[%s1508_s10 + $0x30] sm:$0xff]  ;;  %v292_v18 = vld [vmem:[%s1508_s10 + $0x48] sm:$0xf] }
  0x14   : > { %1371 = vmatprep.subr.bf16.mxu0 %v1370_v8  ;;  %v1376_v16 = vpack.c.bf16 %v289_v15, %v287_v14  ;;  %929 = vperm.xlu0 %1434, %v1357_v17   ;;  %v291_v19 = vld [vmem:[%s1508_s10 + $0x40] sm:$0xf]  ;;  %v1306_v46 = vld [vmem:[%s1508_s10 + $0x58] sm:$0xff]  ;;  %v1308_v47 = vld [vmem:[%s1508_s10 + $0x68] sm:$0xff] }
  0x15   : > { %1373 = vmatpush1.bf16.msra.mxu0 %v1372_v12  ;;  %934 = vperm.xlu1 %1435, %v1358_v30   ;;  %v1382_v52 = vpack.c.bf16 %v1308_v47, %v1306_v46  ;;  %v1305_v53 = vld [vmem:[%s1508_s10 + $0x50] sm:$0xff]  ;;  %v1307_v54 = vld [vmem:[%s1508_s10 + $0x60] sm:$0xff]  ;;  %v1310_v55 = vld [vmem:[%s1508_s10 + $0x78] sm:$0xff] }
  0x16   : > { %1375 = vmatprep.subr.bf16.mxu0 %v1374_v13  ;;  %v1312_v56 = vld [vmem:[%s1508_s10 + $0x88] sm:$0xff]  ;;  %v1384_v58 = vpack.c.bf16 %v1307_v54, %v1305_v53  ;;  %v1309_v60 = vld [vmem:[%s1508_s10 + $0x70] sm:$0xff]  ;;  %v1311_v61 = vld [vmem:[%s1508_s10 + $0x80] sm:$0xff] }
  0x17   : > { %v1386_v59 = vpack.c.bf16 %v1312_v56, %v1310_v55  ;;  %v1388_v63 = vpack.c.bf16 %v1311_v61, %v1309_v60  ;;  %v1314_v1 = vld [vmem:[%s1508_s10 + $0x98] sm:$0xf]  ;;  %v1313_v2 = vld [vmem:[%s1508_s10 + $0x90] sm:$0xf]  ;;  %v1326_v21 = vld [vmem:[%s1508_s10 + $0xa8] sm:$0xff] }
  0x18   : > { %404 = vperm.xlu0 %1434, %v281_v20   ;;  %v1325_v28 = vld [vmem:[%s1508_s10 + $0xa0] sm:$0xff]  ;;  %v1327_v29 = vld [vmem:[%s1508_s10 + $0xb0] sm:$0xff]  ;;  %v1330_v30 = vld [vmem:[%s1508_s10 + $0xc8] sm:$0xff] }
  0x19   : > { %1377 = vmatpush1.bf16.msra.mxu0 %v1376_v16  ;;  %409 = vperm.xlu1 %1435, %v282_v31   ;;  %v1332_v31 = vld [vmem:[%s1508_s10 + $0xd8] sm:$0xff]  ;;  %v1396_v32 = vpack.c.bf16 %v1327_v29, %v1325_v28  ;;  %v1335_v46 = vld [vmem:[%s1718_s1 + $0x20] sm:$0xff]  ;;  %v1353_v54 = vld [vmem:[%s1508_s10 + $0x130] sm:$0xf] }
  0x1a   : > { %1299 = vmatprep.subr.msk.mxu0 %vm314_vm0, %v292_v18  ;;  %v1354_v53 = vld [vmem:[%s1508_s10 + $0x138] sm:$0xf]  ;;  %v1355_v55 = vld [vmem:[%s1718_s1 + $0x30] sm:$0xff] }
  0x1b   : > { %v1356_v56 = vld [vmem:[%s1718_s1 + $0x38] sm:$0xff] }
  0x1c   : > { %1126 = vperm.xlu0 %1434, %v1121_v23  }
  0x1d   : > { %1300 = vmatpush1.msk.msra.mxu0 %vm314_vm0, %v291_v19  ;;  %1131 = vperm.xlu1 %1435, %v1122_v33   ;;  %v1398_v33 = vpack.c.bf16 %v1332_v31, %v1330_v30 }
  0x1e   : > { %1301 = vmatmul.mubr.msk.f32.vlgmr.msra.gmra.mrb[0].mxu0 %vm307_vm1, %v293_v22  ;;  %v1328_v22 = vld [vmem:[%s1508_s10 + $0xb8] sm:$0xff] }
  0x1f   : > { %391 = vmatprep.mubr.f32.mxu0 %v1444_v0  ;;  %v1394_v27 = vpack.c.bf16 %v1328_v22, %v1326_v21 }
  0x20   : > { %1136 = vperm.xlu0 %1434, %v1123_v26  }
  0x22   : > { %1302 = vmatmul.mubr.msk.f32.gmra.mrb[2].mxu0 %vm307_vm1, %v294_v25 }
  0x23   : > { %889 = vmatprep.mubr.f32.mxu0 %v1444_v0 }
  0x87   : > { %v300_v34 = vpop.permute.xlu0 %299  ;;  %v520_v9 = vpop.permute.xlu1 %519 }
  0x8b   : > { %v305_v38 = vpop.permute.xlu0 %304  ;;  %v525_v13 = vpop.permute.xlu1 %524 }
  0xf1   : > { %v387_v35 = vpop.f32.mrb[0].mxu0 }
  0xf2   : > { %v389_v36 = vpop.f32.mrb[1].mxu0  ;;  %v388_v37 = vadd.f32 %v387_v35, %v300_v34  ;;  %v1331_v35 = vld [vmem:[%s1508_s10 + $0xd0] sm:$0xff] }
  0xf3   : > { %v390_v39 = vadd.f32 %v389_v36, %v300_v34  ;;  %v1329_v34 = vld [vmem:[%s1508_s10 + $0xc0] sm:$0xff] }
  0xf4   : > { %v398_v44 = vmax.f32 %v388_v37, 0.0  ;;  %v1400_v36 = vpack.c.bf16 %v1331_v35, %v1329_v34  ;;  %v1334_v37 = vld [vmem:[%s1508_s10 + $0xe8] sm:$0xf] }
  0xf5   : > { %v393_v40 = vpop.f32.mrb[2].mxu0  ;;  %v399_v48 = vmax.f32 %v390_v39, 0.0  ;;  %v1348_v39 = vld [vmem:[%s1508_s10 + $0x108] sm:$0xff] }
  0xf6   : > { %v394_v41 = vadd.f32 %v393_v40, %v305_v38  ;;  %v395_v42 = vpop.f32.mrb[3].mxu0  ;;  %v1345_v40 = vld [vmem:[%s1508_s10 + $0xf0] sm:$0xff] }
  0xf7   : > { %v396_v43 = vadd.f32 %v395_v42, %v305_v38  ;;  %v1346_v38 = vld [vmem:[%s1508_s10 + $0xf8] sm:$0xff] }
  0xf8   : > { %v400_v45 = vmax.f32 %v394_v41, 0.0  ;;  %v1347_v41 = vld [vmem:[%s1508_s10 + $0x100] sm:$0xff]  ;;  %v1350_v42 = vld [vmem:[%s1508_s10 + $0x118] sm:$0xff] }
  0xf9   : > { %v401_v49 = vmax.f32 %v396_v43, 0.0  ;;  %v1352_v43 = vld [vmem:[%s1508_s10 + $0x128] sm:$0xff]  ;;  %v1408_v47 = vpack.c.bf16 %v1347_v41, %v1345_v40 }
  0xfa   : > { %v1380_v50 = vpack.c.bf16 %v400_v45, %v398_v44  ;;  %v1333_v44 = vld [vmem:[%s1508_s10 + $0xe0] sm:$0xf]  ;;  %v1406_v45 = vpack.c.bf16 %v1348_v39, %v1346_v38 }
  0xfb   : > { %v1378_v51 = vpack.c.bf16 %v401_v49, %v399_v48  ;;  %v1410_v48 = vpack.c.bf16 %v1352_v43, %v1350_v42  ;;  %v1349_v49 = vld [vmem:[%s1508_s10 + $0x110] sm:$0xff] }
  0xfd   : > { %1379 = vmatprep.subr.bf16.mxu1 %v1378_v51  ;;  %v1336_v51 = vld [vmem:[%s1718_s1 + $0x28] sm:$0xff] }
  0xfe   : > { %1381 = vmatpush1.bf16.msra.mxu1 %v1380_v50  ;;  %v1351_v50 = vld [vmem:[%s1508_s10 + $0x120] sm:$0xff] }
  0xff   : > { %1383 = vmatprep.subr.bf16.mxu1 %v1382_v52  ;;  %v1412_v52 = vpack.c.bf16 %v1351_v50, %v1349_v49 }
 0x101   : > { %1303 = vmatmul.mubr.msk.f32.vlgmr.msra.gmra.mrb[0].mxu1 %vm412_vm2, %v1574_v57 }
 0x102   : > { %1385 = vmatpush1.bf16.msra.mxu1 %v1384_v58  ;;  %489 = vmatprep.mubr.f32.mxu1 %v1444_v0  ;;  %v725_v58 = vpop.permute.xlu0 %724 }
 0x103   : > { %1387 = vmatprep.subr.bf16.mxu1 %v1386_v59  ;;  %v730_v59 = vpop.permute.xlu1 %729 }
 0x105   : > { %1304 = vmatmul.mubr.msk.f32.gmra.mrb[2].mxu1 %vm412_vm2, %v1584_v62 }
 0x106   : > { %1389 = vmatpush1.bf16.msra.mxu1 %v1388_v63  ;;  %603 = vmatprep.mubr.f32.mxu1 %v1444_v0  ;;  %v930_v60 = vpop.permute.xlu0 %929 }
 0x107   : > { %1319 = vmatprep.subr.msk.mxu1 %vm314_vm0, %v1314_v1  ;;  %v935_v61 = vpop.permute.xlu1 %934 }
 0x10a   : > { %1320 = vmatpush1.msk.msra.mxu1 %vm314_vm0, %v1313_v2  ;;  %v1660_v63 = vpop.permute.xlu0 %404 }
 0x10b   : > { %1321 = vmatmul.mubr.msk.f32.vlgmr.msra.gmra.mrb[4].mxu1 %vm307_vm1, %v1315_v3  ;;  %v1666_v3 = vpop.permute.xlu1 %409 }
 0x10c   : > { %609 = vmatprep.mubr.f32.mxu1 %v1444_v0 }
 0x10f   : > { %1322 = vmatmul.mubr.msk.f32.gmra.mrb[6].mxu1 %vm307_vm1, %v1316_v4 }
 0x110   : > { %684 = vmatprep.mubr.f32.mxu1 %v1444_v0 }
 0x1d4   : > { %v1603_v5 = vpop.f32.mrb[0].mxu1 }
 0x1d5   : > { %v1605_v6 = vpop.f32.mrb[1].mxu1  ;;  %v486_v1 = vadd.f32 %v1603_v5, %v1660_v63 }
 0x1d6   : > { %v488_v2 = vadd.f32 %v1605_v6, %v1660_v63 }
 0x1d8   : > { %v1607_v7 = vpop.f32.mrb[2].mxu1 }
 0x1d9   : > { %v1609_v8 = vpop.f32.mrb[3].mxu1 }
 0x1da   : > { %v494_v5 = vadd.f32 %v1609_v8, %v1666_v3 }
 0x1de   : > { %v605_v10 = vpop.f32.mrb[4].mxu1 }
 0x1df   : > { %v607_v11 = vpop.f32.mrb[5].mxu1  ;;  %v606_v12 = vadd.f32 %v605_v10, %v520_v9 }
 0x1e0   : > { %v608_v14 = vadd.f32 %v607_v11, %v520_v9 }
 0x1e1   : > { %v616_v19 = vmax.f32 %v606_v12, 0.0  ;;  %v496_v12 = vmax.f32 %v486_v1, 0.0 }
 0x1e2   : > { %v611_v15 = vpop.f32.mrb[6].mxu1  ;;  %v617_v23 = vmax.f32 %v608_v14, 0.0  ;;  %v492_v14 = vadd.f32 %v1607_v7, %v1666_v3 }
 0x1e3   : > { %v612_v16 = vadd.f32 %v611_v15, %v525_v13  ;;  %v613_v17 = vpop.f32.mrb[7].mxu1  ;;  %v497_v15 = vmax.f32 %v488_v2, 0.0 }
 0x1e4   : > { %v614_v18 = vadd.f32 %v613_v17, %v525_v13  ;;  %v498_v22 = vmax.f32 %v492_v14, 0.0 }
 0x1e5   : > { %v618_v20 = vmax.f32 %v612_v16, 0.0 }
 0x1e6   : > { %v619_v24 = vmax.f32 %v614_v18, 0.0 }
 0x1e7   : > { %v1392_v25 = vpack.c.bf16 %v618_v20, %v616_v19 }
 0x1e8   : > { %v1390_v26 = vpack.c.bf16 %v619_v24, %v617_v23  ;;  %v499_v24 = vmax.f32 %v494_v5, 0.0 }
 0x1ea   : > { %1391 = vmatprep.subr.bf16.mxu1 %v1390_v26 }
 0x1eb   : > { %1393 = vmatpush1.bf16.msra.mxu1 %v1392_v25 }
 0x1ec   : > { %1395 = vmatprep.subr.bf16.mxu1 %v1394_v27 }
 0x1ee   : > { %1323 = vmatmul.mubr.msk.f32.vlgmr.msra.gmra.mrb[8].mxu1 %vm412_vm2, %v1574_v57 }
 0x1ef   : > { %1397 = vmatpush1.bf16.msra.mxu1 %v1396_v32  ;;  %690 = vmatprep.mubr.f32.mxu1 %v1444_v0 }
 0x1f0   : > { %1399 = vmatprep.subr.bf16.mxu1 %v1398_v33 }
 0x1f2   : > { %1324 = vmatmul.mubr.msk.f32.gmra.mrb[10].mxu1 %vm412_vm2, %v1584_v62 }
 0x1f3   : > { %1401 = vmatpush1.bf16.msra.mxu1 %v1400_v36  ;;  %808 = vmatprep.mubr.f32.mxu1 %v1444_v0 }
 0x1f4   : > { %1339 = vmatprep.subr.msk.mxu1 %vm314_vm0, %v1334_v37 }
 0x1f7   : > { %1340 = vmatpush1.msk.msra.mxu1 %vm314_vm0, %v1333_v44 }
 0x1f8   : > { %1341 = vmatmul.mubr.msk.f32.vlgmr.msra.gmra.mrb[12].mxu1 %vm307_vm1, %v1335_v46  ;;  %1407 = vmatprep.subr.bf16.mxu1 %v1406_v45 }
 0x1f9   : > { %1409 = vmatpush1.bf16.msra.mxu1 %v1408_v47  ;;  %814 = vmatprep.mubr.f32.mxu1 %v1444_v0 }
 0x1fa   : > { %1411 = vmatprep.subr.bf16.mxu1 %v1410_v48 }
 0x1fc   : > { %1342 = vmatmul.mubr.msk.f32.gmra.mrb[14].mxu1 %vm307_vm1, %v1336_v51 }
 0x1fd   : > { %1413 = vmatpush1.bf16.msra.mxu1 %v1412_v52  ;;  %1013 = vmatprep.mubr.f32.mxu1 %v1444_v0 }
 0x1fe   : > { %1359 = vmatprep.subr.msk.mxu1 %vm314_vm0, %v1354_v53 }
 0x201   : > { %1360 = vmatpush1.msk.msra.mxu1 %vm314_vm0, %v1353_v54 }
 0x202   : > { %1361 = vmatmul.mubr.msk.f32.vlgmr.msra.gmra.mrb[16].mxu1 %vm307_vm1, %v1355_v55 }
 0x203   : > { %1019 = vmatprep.mubr.f32.mxu1 %v1444_v0 }
 0x206   : > { %1362 = vmatmul.mubr.msk.f32.gmra.mrb[18].mxu1 %vm307_vm1, %v1356_v56 }
 0x2c1   : > { %v686_v4 = vpop.f32.mrb[8].mxu1 }
 0x2c2   : > { %v687_v9 = vadd.f32 %v686_v4, %v1660_v63  ;;  %v688_v10 = vpop.f32.mrb[9].mxu1 }
 0x2c3   : > { %v689_v11 = vadd.f32 %v688_v10, %v1660_v63 }
 0x2c4   : > { %v697_v13 = vmax.f32 %v687_v9, 0.0 }
 0x2c5   : > { %v698_v16 = vmax.f32 %v689_v11, 0.0  ;;  %v692_v17 = vpop.f32.mrb[10].mxu1 }
 0x2c6   : > { %v701_v6 = vadd.f32 %v697_v13, %v496_v12  ;;  %v693_v18 = vadd.f32 %v692_v17, %v1666_v3  ;;  %v694_v19 = vpop.f32.mrb[11].mxu1 }
 0x2c7   : > { %v702_v20 = vadd.f32 %v698_v16, %v497_v15  ;;  %v695_v21 = vadd.f32 %v694_v19, %v1666_v3 }
 0x2c8   : > { %v699_v23 = vmax.f32 %v693_v18, 0.0 }
 0x2c9   : > { %v700_v25 = vmax.f32 %v695_v21, 0.0 }
 0x2ca   : > { %v703_v26 = vadd.f32 %v699_v23, %v498_v22 }
 0x2cb   : > { %v704_v27 = vadd.f32 %v700_v25, %v499_v24  ;;  %v810_v7 = vpop.f32.mrb[12].mxu1 }
 0x2cc   : > { %v812_v28 = vpop.f32.mrb[13].mxu1  ;;  %v811_v29 = vadd.f32 %v810_v7, %v725_v58 }
 0x2cd   : > { %v813_v30 = vadd.f32 %v812_v28, %v725_v58  ;;  %v1117_v28 = vld [vmem:[%s1722_s5 + $0x10] sm:$0x1f] }
 0x2ce   : > { %v821_v34 = vmax.f32 %v811_v29, 0.0  ;;  %v1127_v29 = vpop.permute.xlu0 %1126 }
 0x2cf   : > { %v816_v8 = vpop.f32.mrb[14].mxu1  ;;  %v822_v36 = vmax.f32 %v813_v30, 0.0 }
 0x2d0   : > { %v817_v31 = vadd.f32 %v816_v8, %v730_v59  ;;  %v818_v32 = vpop.f32.mrb[15].mxu1 }
 0x2d1   : > { %v819_v33 = vadd.f32 %v818_v32, %v730_v59 }
 0x2d2   : > { %v823_v35 = vmax.f32 %v817_v31, 0.0 }
 0x2d3   : > { %v824_v37 = vmax.f32 %v819_v33, 0.0  ;;  %v1132_v33 = vpop.permute.xlu1 %1131 }
 0x2d4   : > { %v1404_v38 = vpack.c.bf16 %v823_v35, %v821_v34 }
 0x2d5   : > { %v1402_v39 = vpack.c.bf16 %v824_v37, %v822_v36  ;;  %v1015_v40 = vpop.f32.mrb[16].mxu1  ;;  %v1137_v37 = vpop.permute.xlu0 %1136 }
 0x2d6   : > { %v1017_v41 = vpop.f32.mrb[17].mxu1  ;;  %v1016_v42 = vadd.f32 %v1015_v40, %v930_v60 }
 0x2d7   : > { %1403 = vmatprep.subr.bf16.mxu0 %v1402_v39  ;;  %v1018_v43 = vadd.f32 %v1017_v41, %v930_v60 }
 0x2d8   : > { %1405 = vmatpush1.bf16.msra.mxu0 %v1404_v38  ;;  %v1026_v48 = vmax.f32 %v1016_v42, 0.0 }
 0x2d9   : > { %v1021_v44 = vpop.f32.mrb[18].mxu1  ;;  %v1027_v50 = vmax.f32 %v1018_v43, 0.0 }
 0x2da   : > { %v1022_v45 = vadd.f32 %v1021_v44, %v935_v61  ;;  %v1023_v46 = vpop.f32.mrb[19].mxu1 }
 0x2db   : > { %v1024_v47 = vadd.f32 %v1023_v46, %v935_v61  ;;  %1343 = vmatmul.mubr.msk.f32.vlgmr.msra.gmra.mrb[4].mxu0 %vm412_vm2, %v1574_v57 }
 0x2dc   : > { %v1028_v49 = vmax.f32 %v1022_v45, 0.0  ;;  %895 = vmatprep.mubr.f32.mxu0 %v1444_v0 }
 0x2dd   : > { %v1029_v51 = vmax.f32 %v1024_v47, 0.0 }
 0x2de   : > { %v1416_v52 = vpack.c.bf16 %v1028_v49, %v1026_v48 }
 0x2df   : > { %v1414_v53 = vpack.c.bf16 %v1029_v51, %v1027_v50  ;;  %1344 = vmatmul.mubr.msk.f32.gmra.mrb[6].mxu0 %vm412_vm2, %v1584_v62 }
 0x2e0   : > { %1094 = vmatprep.mubr.f32.mxu0 %v1444_v0 }
 0x2e1   : > { %1415 = vmatprep.subr.bf16.mxu0 %v1414_v53 }
 0x2e2   : > { %1417 = vmatpush1.bf16.msra.mxu0 %v1416_v52 }
 0x2e5   : > { %1363 = vmatmul.mubr.msk.f32.vlgmr.msra.gmra.mrb[8].mxu0 %vm412_vm2, %v1574_v57 }
 0x2e6   : > { %1100 = vmatprep.mubr.f32.mxu0 %v1444_v0 }
 0x2e9   : > { %1364 = vmatmul.mubr.msk.f32.gmra.mrb[10].mxu0 %vm412_vm2, %v1584_v62 }
 0x2ea   : > { %1212 = vmatprep.mubr.f32.mxu0 %v1444_v0 }
 0x3ae   : > { %v891_v54 = vpop.f32.mrb[4].mxu0 }
 0x3af   : > { %v892_v55 = vadd.f32 %v891_v54, %v1660_v63  ;;  %v893_v56 = vpop.f32.mrb[5].mxu0 }
 0x3b0   : > { %v894_v58 = vadd.f32 %v893_v56, %v1660_v63 }
 0x3b1   : > { %v902_v59 = vmax.f32 %v892_v55, 0.0 }
 0x3b2   : > { %v903_v60 = vmax.f32 %v894_v58, 0.0  ;;  %v897_v61 = vpop.f32.mrb[6].mxu0 }
 0x3b3   : > { %v906_v1 = vadd.f32 %v902_v59, %v701_v6  ;;  %v898_v2 = vadd.f32 %v897_v61, %v1666_v3  ;;  %v899_v57 = vpop.f32.mrb[7].mxu0 }
 0x3b4   : > { %v907_v4 = vadd.f32 %v903_v60, %v702_v20  ;;  %v900_v9 = vadd.f32 %v899_v57, %v1666_v3 }
 0x3b5   : > { %v904_v10 = vmax.f32 %v898_v2, 0.0 }
 0x3b6   : > { %v905_v62 = vmax.f32 %v900_v9, 0.0 }
 0x3b7   : > { %v908_v11 = vadd.f32 %v904_v10, %v703_v26 }
 0x3b8   : > { %v909_v12 = vadd.f32 %v905_v62, %v704_v27  ;;  %v1096_v13 = vpop.f32.mrb[8].mxu0 }
 0x3b9   : > { %v1097_v14 = vadd.f32 %v1096_v13, %v1660_v63  ;;  %v1098_v15 = vpop.f32.mrb[9].mxu0 }
 0x3ba   : > { %v1099_v5 = vadd.f32 %v1098_v15, %v1660_v63  ;;  %v1115_v63 = vld [vmem:[%s1722_s5] sm:$0xff] }
 0x3bb   : > { %v1107_v16 = vmax.f32 %v1097_v14, 0.0 }
 0x3bc   : > { %v1108_v17 = vmax.f32 %v1099_v5, 0.0  ;;  %v1102_v18 = vpop.f32.mrb[10].mxu0 }
 0x3bd   : > { %v1111_v6 = vadd.f32 %v1107_v16, %v906_v1  ;;  %v1103_v19 = vadd.f32 %v1102_v18, %v1666_v3  ;;  %v1104_v21 = vpop.f32.mrb[11].mxu0 }
 0x3be   : > { %v1112_v20 = vadd.f32 %v1108_v17, %v907_v4  ;;  %v1105_v22 = vadd.f32 %v1104_v21, %v1666_v3  ;;  %v1116_v3 = vld [vmem:[%s1722_s5 + $0x8] sm:$0xff] }
 0x3bf   : > { %v1109_v23 = vmax.f32 %v1103_v19, 0.0 }
 0x3c0   : > { %v1110_v24 = vmax.f32 %v1105_v22, 0.0 }
 0x3c1   : > { %v1113_v25 = vadd.f32 %v1109_v23, %v908_v11 }
 0x3c2   : > { %v1114_v26 = vadd.f32 %v1110_v24, %v909_v12 }
 0x3c3   : > { %v1420_v27 = vpack.c.bf16 %v1113_v25, %v1111_v6 }
 0x3c4   : > { %v1418_v7 = vpack.c.bf16 %v1114_v26, %v1112_v20 }
 0x3c6   : > { %1419 = vmatprep.subr.bf16.mxu0 %v1418_v7 }
 0x3c7   : > { %1421 = vmatpush1.bf16.msra.mxu0 %v1420_v27 }
 0x3ca   : > { %1365 = vmatmul.mubr.msk.f32.vlgmr.msra.gmra.mrb[12].mxu0 %vm412_vm2, %v1115_v63 }
 0x3cb   : > { %1218 = vmatprep.mubr.f32.mxu0 %v1444_v0 }
 0x3ce   : > { %1366 = vmatmul.mubr.msk.f32.gmra.mrb[14].mxu0 %vm412_vm2, %v1116_v3 }
 0x3cf   : > { %1224 = vmatprep.mubr.f32.mxu0 %v1444_v0 }
 0x3d2   : > { %1367 = vmatmul.mubr.msk.f32.gmra.mrb[16].mxu0 %vm412_vm2, %v1117_v28 }
 0x49d   : > { %v1214_v30 = vpop.f32.mrb[12].mxu0 }
 0x49e   : > { %v1215_v8 = vadd.f32 %v1214_v30, %v1127_v29  ;;  %v1216_v31 = vpop.f32.mrb[13].mxu0 }
 0x49f   : > { %v1217_v32 = vadd.f32 %v1216_v31, %v1127_v29 }
 0x4a0   : > { %1231 = vst [vmem:[%s278_s21] sm:$0xff] %v1215_v8 }
 0x4a1   : > { %1232 = vst [vmem:[%s278_s21 + $0x8] sm:$0xff] %v1217_v32  ;;  %v1220_v0 = vpop.f32.mrb[14].mxu0 }
 0x4a2   : > { %v1221_v34 = vadd.f32 %v1220_v0, %v1132_v33  ;;  %v1222_v35 = vpop.f32.mrb[15].mxu0 }
 0x4a3   : > { %v1223_v36 = vadd.f32 %v1222_v35, %v1132_v33 }
 0x4a4   : > { %1233 = vst [vmem:[%s278_s21 + $0x10] sm:$0xff] %v1221_v34 }
 0x4a5   : > { %1234 = vst [vmem:[%s278_s21 + $0x18] sm:$0xff] %v1223_v36  ;;  %v1226_v38 = vpop.f32.mrb[16].mxu0 }
 0x4a6   : > { %v1227_v39 = vadd.f32 %v1226_v38, %v1137_v37  ;;  %v1228_v40 = vpop.f32.mrb[17].mxu0 }
 0x4a7   : > { %v1229_v41 = vadd.f32 %v1228_v40, %v1137_v37 }
 0x4a8   : > { %1235 = vst [vmem:[%s278_s21 + $0x20] sm:$0x1f] %v1227_v39 }
 0x4a9   : > { %1236 = vst [vmem:[%s278_s21 + $0x28] sm:$0x1f] %v1229_v41 }
 0x4aa PF: > { %s17_s24 = sadd.s32 1, %s1442_s24  }
 0x4ab   : > { %p14_p4 = scmp.ge.s32.totalorder %s17_s24, 4  }
 0x4ad   :  { %16 = sbr.rel (!%p14_p4) target bundleno = 1 (0x1), region = 87 }

</bundles_post_ra>
